<compile_context>
chip_gen: v7x
topology: tpu7x:2x2x1
jax: 0.10.0
libtpu: 0.0.40
codegen_flags: <defaults>
</compile_context>

<pallas_src>
import functools

import jax
import jax.numpy as jnp
from jax import lax
from jax.experimental import pallas as pl
from jax.experimental.pallas import tpu as pltpu


def _decoder_embed_kernel(sel_ref, x_ref, w_ref, b_ref, mask_ref, pos_ref,
                          out_ref, *, mxu_dtype):
    # sel_ref:  (TB, P+1) int32 selector into y's S_pad rows; -1 => mask token.
    #           Row 0 is always 0 (CLS token).
    # x_ref:    (TB, S_pad, E)  encoder outputs, zero-padded along S.
    # w_ref:    (E, D)   b_ref / mask_ref: (1, D)   pos_ref: (1, P+1, D)
    # out_ref:  (TB, P+1, D)
    TB, S_pad, E = x_ref.shape
    P1 = sel_ref.shape[1]

    # --- decoder_embed: Linear(E -> D), one big MXU matmul per grid step ----
    x2d = x_ref[...].reshape(TB * S_pad, E).astype(mxu_dtype)
    y2d = jnp.dot(x2d, w_ref[...].astype(mxu_dtype),
                  preferred_element_type=jnp.float32) + b_ref[...]
    y = y2d.reshape(TB, S_pad, -1)                                 # f32

    # --- fused concat + gather + CLS re-prepend as a one-hot MXU matmul -----
    sel = sel_ref[...]                                             # (TB, P+1)
    j_iota = lax.broadcasted_iota(jnp.int32, (TB, P1, S_pad), 2)
    onehot = (sel[:, :, None] == j_iota).astype(mxu_dtype)         # exact 0/1
    gathered = jnp.einsum("bps,bsd->bpd", onehot, y.astype(mxu_dtype),
                          preferred_element_type=jnp.float32)      # (TB,P+1,D)
    is_masked = (sel < 0).astype(jnp.float32)[:, :, None]          # (TB,P+1,1)

    # --- single aligned full-block store (pos add fused in) -----------------
    out_ref[...] = (gathered + is_masked * mask_ref[...]
                    + pos_ref[...]).astype(out_ref.dtype)


def _device_hints():
    """Returns (preferred min grid steps, per-step VMEM budget bytes)."""
    want_steps, budget = 1, 48 << 20
    try:
        kind = jax.devices()[0].device_kind.lower()
        if "v7" in kind:
            want_steps, budget = 2, 40 << 20   # 2 TCs, only 64 MiB VMEM per TC
        elif "v6" in kind:
            want_steps, budget = 1, 96 << 20   # single TC, 128 MiB physical
        elif "v5" in kind:
            want_steps, budget = 1, 80 << 20   # explicit limit > 16 MiB default
    except Exception:
        pass
    return want_steps, budget


def _step_vmem_bytes(tb, s_pad, e, p1, d, x_item, out_item):
    dbuf = 2  # BlockSpec double-buffering
    x_blk = dbuf * tb * s_pad * e * x_item
    sel_blk = dbuf * tb * p1 * 4
    out_blk = dbuf * tb * p1 * d * out_item
    params = dbuf * (e * d + 2 * d + p1 * d) * 4
    # y, one-hot, gathered intermediates (budgeted as f32, 2x headroom).
    inter = 2 * tb * (s_pad * d + p1 * s_pad + 2 * p1 * d) * 4
    return x_blk + sel_blk + out_blk + params + inter


def _pick_batch_tile(batch, s_pad, e, p1, d, x_item, out_item,
                     vmem_budget, want_steps):
    divisors = [t for t in range(batch, 0, -1) if batch % t == 0]
    fitting = [t for t in divisors
               if _step_vmem_bytes(t, s_pad, e, p1, d, x_item, out_item)
               <= vmem_budget]
    if not fitting:
        return 1
    if want_steps >= 2:
        # v7x megacore: keep an even number of grid steps so neither TC idles.
        pref = [t for t in fitting
                if (batch // t) >= want_steps and (batch // t) % 2 == 0]
        if pref:
            return pref[0]
    return fitting[0]


def decoder_embeddings(x, ids_restore, w, b, mask_token, pos_emb,
                       *, batch_tile=None, mxu_dtype=jnp.bfloat16,
                       out_dtype=None, vmem_budget_bytes=None):
    """x: (B, S, E), ids_restore: (B, P) -> (B, P+1, D).

    mxu_dtype: bf16 by default (full-rate MXU on v5e/v6e/v7x, ~1e-3 relative
      rounding); pass jnp.float32 for bit-tight parity with an f32 reference.
    out_dtype: pass jnp.bfloat16 if the downstream decoder consumes bf16
      (halves the dominant (B, P+1, D) HBM writeback traffic).
    """
    B, S, E = x.shape
    P = ids_restore.shape[1]
    D = w.shape[-1]
    out_dtype = x.dtype if out_dtype is None else out_dtype

    # --- host-side index plumbing (tiny O(B*P) int ops) ---------------------
    # sel_full[b, 0]   = 0                       -> CLS row y[b, 0]
    # sel_full[b, 1+i] = ids[b, i] + 1 (visible) -> y[b, ids+1]
    #                  = -1           (masked)   -> zero row + mask token
    # TODO(synk): torch.gather would raise on out-of-range / negative ids;
    # here ids >= S-1 (incl. OOB) take the mask token and negative ids select
    # the CLS row instead of erroring.
    ids = ids_restore.astype(jnp.int32)
    sel = jnp.where(ids >= S - 1, jnp.int32(-1), ids + 1)
    sel_full = jnp.concatenate([jnp.zeros((B, 1), jnp.int32), sel], axis=1)

    # Zero-pad S to a multiple of 8: the in-kernel reshape stays tile-aligned
    # and the gather matmul's K=S contraction is 8-aligned.  Padded rows are
    # never selected by the one-hot (visible sel < S, masked sel == -1).
    S_pad = -(-S // 8) * 8
    if S_pad != S:
        x = jnp.pad(x, ((0, 0), (0, S_pad - S), (0, 0)))

    b2 = jnp.reshape(b, (1, D)).astype(jnp.float32)
    mask2 = jnp.reshape(mask_token, (1, D)).astype(jnp.float32)
    pos3 = jnp.reshape(pos_emb, (1, P + 1, D)).astype(jnp.float32)

    want_steps, budget = _device_hints()
    if vmem_budget_bytes is not None:
        budget = vmem_budget_bytes
    if batch_tile is None:
        TB = _pick_batch_tile(B, S_pad, E, P + 1, D, x.dtype.itemsize,
                              jnp.dtype(out_dtype).itemsize, budget, want_steps)
    else:
        TB = batch_tile
    assert B % TB == 0, "batch_tile must divide batch"

    kernel = functools.partial(_decoder_embed_kernel, mxu_dtype=mxu_dtype)

    grid_spec = pltpu.PrefetchScalarGridSpec(
        num_scalar_prefetch=0,
        grid=(B // TB,),
        in_specs=[
            pl.BlockSpec((TB, P + 1), lambda bi: (bi, 0)),        # sel_full
            pl.BlockSpec((TB, S_pad, E), lambda bi: (bi, 0, 0)),  # x (padded)
            pl.BlockSpec((E, D), lambda bi: (0, 0)),              # weight
            pl.BlockSpec((1, D), lambda bi: (0, 0)),              # bias
            pl.BlockSpec((1, D), lambda bi: (0, 0)),              # mask token
            pl.BlockSpec((1, P + 1, D), lambda bi: (0, 0, 0)),    # pos emb
        ],
        out_specs=pl.BlockSpec((TB, P + 1, D), lambda bi: (bi, 0, 0)),
    )

    # TODO(synk): with D < 128 (toy config) the output store is a masked
    # vst.msk; real MAE D=512 is lane-dense so the full-block store is unmasked.
    return pl.pallas_call(
        kernel,
        out_shape=jax.ShapeDtypeStruct((B, P + 1, D), out_dtype),
        grid_spec=grid_spec,
        compiler_params=pltpu.CompilerParams(
            dimension_semantics=("parallel",),
            vmem_limit_bytes=int(budget)),
    )(sel_full, x, w, b2, mask2, pos3)


def decoder_embeddings_ref(x, ids_restore, w, b, mask_token, pos_emb):
    """Pure-JAX reference matching the PyTorch forward."""
    D = w.shape[-1]
    y = x @ w + jnp.reshape(b, (1, 1, D))                       # (B, S, D)
    B, S, _ = y.shape
    P = ids_restore.shape[1]
    mask_tokens = jnp.broadcast_to(jnp.reshape(mask_token, (1, 1, D)),
                                   (B, P + 1 - S, D))
    x_ = jnp.concatenate([y[:, 1:, :], mask_tokens], axis=1)    # (B, P, D)
    x_ = jnp.take_along_axis(x_, ids_restore[:, :, None], axis=1)
    full = jnp.concatenate([y[:, :1, :], x_], axis=1)           # (B, P+1, D)
    return full + jnp.reshape(pos_emb, (1, P + 1, D))


if __name__ == "__main__":
    # image_size=64, patch_size=16 -> P = 16 patches; encoder keeps 8 + CLS
    # -> S = 9; encoder_embed_dim E = 32, decoder_embed_dim D = 32, batch = 2.
    B, S, E, D, P = 2, 9, 32, 32, 16

    key = jax.random.PRNGKey(0)
    kx, kw, kb, km, kp, kperm0, kperm1 = jax.random.split(key, 7)

    x = jax.random.normal(kx, (B, S, E), dtype=jnp.float32)
    # ids_restore: per-batch permutation of [0, P)
    ids_restore = jnp.stack([
        jax.random.permutation(kperm0, P),
        jax.random.permutation(kperm1, P),
    ]).astype(jnp.int32)

    # Module parameters: Linear(E, D) weight/bias, mask_token (1, 1, D),
    # position_embeddings (1, P+1, D).
    w = jax.random.normal(kw, (E, D), dtype=jnp.float32) * 0.02
    b = jax.random.normal(kb, (D,), dtype=jnp.float32) * 0.02
    mask_token = jax.random.normal(km, (1, 1, D), dtype=jnp.float32) * 0.02
    pos_emb = jax.random.normal(kp, (1, P + 1, D), dtype=jnp.float32) * 0.02

    ref = decoder_embeddings_ref(x, ids_restore, w, b, mask_token, pos_emb)

    # f32-MXU path: bit-tight parity with the f32 reference.
    out_f32 = decoder_embeddings(x, ids_restore, w, b, mask_token, pos_emb,
                                 mxu_dtype=jnp.float32)
    out_f32 = jax.block_until_ready(out_f32)
    assert out_f32.shape == (B, P + 1, D)
    assert jnp.allclose(out_f32, ref, atol=1e-5, rtol=1e-5), "f32 mismatch"

    # Default bf16-MXU path (full-rate MXU): ~1e-3 operand-rounding error.
    out_def = decoder_embeddings(x, ids_restore, w, b, mask_token, pos_emb)
    out_def = jax.block_until_ready(out_def)
    assert out_def.shape == (B, P + 1, D)
    assert jnp.allclose(out_def, ref, atol=5e-3, rtol=5e-2), "bf16 mismatch"

    print("KERNEL_OK")
</pallas_src>

<mosaic_0001>
module attributes {stable_mosaic.version = 11 : i64} {
  func.func @_decoder_embed_kernel(%arg0: i32, %arg1: memref<2x17xi32, #tpu.memory_space<vmem>>, %arg2: memref<2x16x32xf32, #tpu.memory_space<vmem>>, %arg3: memref<32x32xf32, #tpu.memory_space<vmem>>, %arg4: memref<1x32xf32, #tpu.memory_space<vmem>>, %arg5: memref<1x32xf32, #tpu.memory_space<vmem>>, %arg6: memref<1x17x32xf32, #tpu.memory_space<vmem>>, %arg7: memref<2x17x32xf32, #tpu.memory_space<vmem>>) attributes {dimension_semantics = [#tpu.dimension_semantics<parallel>], iteration_bounds = array<i64: 1>, scalar_prefetch = 0 : i64, scratch_operands = 0 : i64, tpu.core_type = #tpu.core_type<tc>, window_params = [{transform_indices = @transform_0, window_bounds = array<i64: 2, 17>}, {transform_indices = @transform_1, window_bounds = array<i64: 2, 16, 32>}, {pipeline_mode = #tpu.pipeline_mode<synchronous>, transform_indices = @transform_2, window_bounds = array<i64: 32, 32>}, {pipeline_mode = #tpu.pipeline_mode<synchronous>, transform_indices = @transform_3, window_bounds = array<i64: 1, 32>}, {pipeline_mode = #tpu.pipeline_mode<synchronous>, transform_indices = @transform_4, window_bounds = array<i64: 1, 32>}, {pipeline_mode = #tpu.pipeline_mode<synchronous>, transform_indices = @transform_5, window_bounds = array<i64: 1, 17, 32>}, {transform_indices = @transform_6, window_bounds = array<i64: 2, 17, 32>}]} {
    %c0 = arith.constant 0 : index
    %c0_0 = arith.constant 0 : index
    %c0_1 = arith.constant 0 : index
    %0 = vector.load %arg2[%c0, %c0_0, %c0_1] : memref<2x16x32xf32, #tpu.memory_space<vmem>>, vector<2x16x32xf32>
    %1 = vector.shape_cast %0 : vector<2x16x32xf32> to vector<32x32xf32>
    %c0_2 = arith.constant 0 : index
    %c0_3 = arith.constant 0 : index
    %2 = vector.load %arg3[%c0_2, %c0_3] : memref<32x32xf32, #tpu.memory_space<vmem>>, vector<32x32xf32>
    %cst = arith.constant dense<0.000000e+00> : vector<32x32xf32>
    %3 = tpu.matmul %1, %2, %cst {dimension_numbers = #tpu.dot_dimension_numbers<[1], [0], [0], [1], [0, 0, 1, 1], [], []>} : vector<32x32xf32>, vector<32x32xf32>, vector<32x32xf32> -> vector<32x32xf32>
    %c0_4 = arith.constant 0 : index
    %c0_5 = arith.constant 0 : index
    %4 = vector.load %arg4[%c0_4, %c0_5] : memref<1x32xf32, #tpu.memory_space<vmem>>, vector<1x32xf32>
    %5 = vector.broadcast %4 : vector<1x32xf32> to vector<32x32xf32>
    %6 = arith.addf %3, %5 : vector<32x32xf32>
    %7 = vector.shape_cast %6 : vector<32x32xf32> to vector<2x16x32xf32>
    %c0_6 = arith.constant 0 : index
    %c0_7 = arith.constant 0 : index
    %8 = vector.load %arg1[%c0_6, %c0_7] : memref<2x17xi32, #tpu.memory_space<vmem>>, vector<2x17xi32>
    %9 = tpu.iota {dimensions = array<i32: 2>} : vector<2x17x16xi32>
    %10 = vector.shape_cast %8 : vector<2x17xi32> to vector<2x17x1xi32>
    %11 = vector.broadcast %10 : vector<2x17x1xi32> to vector<2x17x16xi32>
    %12 = arith.cmpi eq, %11, %9 : vector<2x17x16xi32>
    %13 = arith.extui %12 : vector<2x17x16xi1> to vector<2x17x16xi32>
    %14 = arith.sitofp %13 : vector<2x17x16xi32> to vector<2x17x16xf32>
    "tpu.trace_start"() <{level = 10 : i32, message = "bps,bsd->bpd"}> : () -> ()
    %cst_8 = arith.constant dense<0.000000e+00> : vector<2x17x32xf32>
    %15 = tpu.matmul %14, %7, %cst_8 {dimension_numbers = #tpu.dot_dimension_numbers<[2], [1], [1], [2], [0, 0, 0, 1, 1, 2], [0], [0]>} : vector<2x17x16xf32>, vector<2x16x32xf32>, vector<2x17x32xf32> -> vector<2x17x32xf32>
    %c0_i32 = arith.constant 0 : i32
    "tpu.trace_stop"() : () -> ()
    %16 = vector.broadcast %c0_i32 : i32 to vector<2x17xi32>
    %17 = arith.cmpi slt, %8, %16 : vector<2x17xi32>
    %18 = arith.extui %17 : vector<2x17xi1> to vector<2x17xi32>
    %19 = arith.sitofp %18 : vector<2x17xi32> to vector<2x17xf32>
    %20 = vector.shape_cast %19 : vector<2x17xf32> to vector<2x17x1xf32>
    %c0_9 = arith.constant 0 : index
    %c0_10 = arith.constant 0 : index
    %21 = vector.load %arg5[%c0_9, %c0_10] : memref<1x32xf32, #tpu.memory_space<vmem>>, vector<1x32xf32>
    %22 = vector.shape_cast %21 : vector<1x32xf32> to vector<1x1x32xf32>
    %23 = vector.broadcast %20 : vector<2x17x1xf32> to vector<2x17x32xf32>
    %24 = vector.broadcast %22 : vector<1x1x32xf32> to vector<2x17x32xf32>
    %25 = arith.mulf %23, %24 : vector<2x17x32xf32>
    %26 = arith.addf %15, %25 : vector<2x17x32xf32>
    %c0_11 = arith.constant 0 : index
    %c0_12 = arith.constant 0 : index
    %c0_13 = arith.constant 0 : index
    %27 = vector.load %arg6[%c0_11, %c0_12, %c0_13] : memref<1x17x32xf32, #tpu.memory_space<vmem>>, vector<1x17x32xf32>
    %28 = vector.broadcast %27 : vector<1x17x32xf32> to vector<2x17x32xf32>
    %29 = arith.addf %26, %28 : vector<2x17x32xf32>
    %c0_14 = arith.constant 0 : index
    %c0_15 = arith.constant 0 : index
    %c0_16 = arith.constant 0 : index
    %30 = vector.load %arg7[%c0_14, %c0_15, %c0_16] : memref<2x17x32xf32, #tpu.memory_space<vmem>>, vector<2x17x32xf32>
    tpu.vector_store %arg7[%c0_14, %c0_15, %c0_16], %29 {strides = array<i32>} : memref<2x17x32xf32, #tpu.memory_space<vmem>>, vector<2x17x32xf32>,
    return
  }
  func.func @transform_0(%arg0: i32) -> (i32, i32) {
    %c0_i32 = arith.constant 0 : i32
    %c0_i32_0 = arith.constant 0 : i32
    return %arg0, %c0_i32 : i32, i32
  }
  func.func @transform_1(%arg0: i32) -> (i32, i32, i32) {
    %c0_i32 = arith.constant 0 : i32
    %c0_i32_0 = arith.constant 0 : i32
    %c0_i32_1 = arith.constant 0 : i32
    return %arg0, %c0_i32, %c0_i32_0 : i32, i32, i32
  }
  func.func @transform_2(%arg0: i32) -> (i32, i32) {
    %c0_i32 = arith.constant 0 : i32
    %c0_i32_0 = arith.constant 0 : i32
    %c0_i32_1 = arith.constant 0 : i32
    return %c0_i32, %c0_i32_0 : i32, i32
  }
  func.func @transform_3(%arg0: i32) -> (i32, i32) {
    %c0_i32 = arith.constant 0 : i32
    %c0_i32_0 = arith.constant 0 : i32
    %c0_i32_1 = arith.constant 0 : i32
    return %c0_i32, %c0_i32_0 : i32, i32
  }
  func.func @transform_4(%arg0: i32) -> (i32, i32) {
    %c0_i32 = arith.constant 0 : i32
    %c0_i32_0 = arith.constant 0 : i32
    %c0_i32_1 = arith.constant 0 : i32
    return %c0_i32, %c0_i32_0 : i32, i32
  }
  func.func @transform_5(%arg0: i32) -> (i32, i32, i32) {
    %c0_i32 = arith.constant 0 : i32
    %c0_i32_0 = arith.constant 0 : i32
    %c0_i32_1 = arith.constant 0 : i32
    %c0_i32_2 = arith.constant 0 : i32
    return %c0_i32, %c0_i32_0, %c0_i32_1 : i32, i32, i32
  }
  func.func @transform_6(%arg0: i32) -> (i32, i32, i32) {
    %c0_i32 = arith.constant 0 : i32
    %c0_i32_0 = arith.constant 0 : i32
    %c0_i32_1 = arith.constant 0 : i32
    return %arg0, %c0_i32, %c0_i32_0 : i32, i32, i32
  }
}

</mosaic_0001>

<bundles_post_ra>
// kernel: tpu_custom_call.1
= control target key start
LH: loop header
LB: loop body
LE: loop exit
PB: predicated region body
PF: predicated region fallthrough
CT: control target
= control target key end

     0   :  { %11 = vsyncpa [#allocation3], 0  ;;  %s572_s21 = smov [#allocation2]   ;;  %s693_s0 = inlined_call_operand.vmem [shape: s32[2,17], index: 0, kind: input, shape index: {}]   ;;  %s694_s1 = inlined_call_operand.vmem [shape: f32[2,16,32], index: 1, kind: input, shape index: {}]   ;;  %s695_s2 = inlined_call_operand.hbm [shape: f32[32,32], index: 2, kind: input, shape index: {}]   ;;  %s696_s3 = inlined_call_operand.vmem [shape: f32[1,32], index: 3, kind: input, shape index: {}]   ;;  %s697_s4 = inlined_call_operand.vmem [shape: f32[1,32], index: 4, kind: input, shape index: {}]   ;;  %s698_s5 = inlined_call_operand.vmem [shape: f32[1,17,32], index: 5, kind: input, shape index: {}]   ;;  %s699_s6 = inlined_call_operand.vmem [shape: f32[2,17,32], index: 6, kind: output, shape index: {}]  }
   0x1   :  { %s21_s22 = sshll.u32 %s572_s21, 4  ;;  %s548_s25 = scalar_lea.hbm %s695_s2, 512  ;;  %s22_s22 = int_to_ptr.vmem [resolvable:$true] %s21_s22 }
   0x2   :  { %p549_p0 = scmp.ne.s32.totalorder %s695_s2, %s548_s25  ;;  %p552_p1 = scmp.lt.u32.totalorder %s548_s25, %s695_s2 }
   0x4   :  { %p554_p2 = pnand %p552_p1, %p549_p0 }
   0x6   :  { %557 = shalt.err (!%p554_p2)
}
   0x7   :  { %s558_s30 = scalar_lea.vmem %s22_s22, 512  ;;  %p563_p4 = scmp.lt.s32.totalorder %s22_s22, %s22_s22 }
   0x8   :  { %p559_p3 = scmp.ne.s32.totalorder %s22_s22, %s558_s30  ;;  %p564_p5 = scmp.lt.s32.totalorder %s558_s30, %s558_s30 }
   0xa   :  { %p565_p6 = por %p564_p5, %p563_p4 }
   0xc   :  { %p566_p7 = pnand %p565_p6, %p559_p3 }
   0xe   :  { %569 = shalt.err (!%p566_p7)
}
   0xf   :  { %s573_s7 = smov 128   ;;  %s574_s8 = smov 8  }
  0x10   :  { %27 = dma.hbm_to_vmem [thread:$0]  %s695_s2, 512, %s22_s22, [#allocation3], %s573_s7, %s573_s7, %s574_s8  }
  0x11   :  { %570 = dma.done.wait [#allocation3], 512  }
  0x12   :  { %571 = vsyncadd [#allocation3], 4294966784  ;;  %v151_v0 = vlaneseq  ;;  %vm52_vm0 = vcmask 261120   ;;  %v41_v3 = vld [vmem:[#allocation2] sm:$0xff]  ;;  %v42_v4 = vld [vmem:[#allocation2 + $0x8] sm:$0xff]  ;;  %v575_v17 = vmov 0.0|0.0  }
  0x13   :  { %v43_v5 = vld [vmem:[#allocation2 + $0x10] sm:$0xff]  ;;  %v524_v6 = vpack.c.bf16 %v42_v4, %v41_v3  ;;  %v44_v7 = vld [vmem:[#allocation2 + $0x18] sm:$0xff]  ;;  %v37_v8 = vld [vmem:[%s694_s1] sm:$0xff]  ;;  %vm576_vm1 = vmmov 0   ;;  %v577_v18 = vmov 0.0   ;;  %vm247_vm5 = vcmask 130048  }
  0x14   :  { %v154_v1 = vshrl.u32 %v151_v0, 7  ;;  %v39_v9 = vld [vmem:[%s694_s1 + $0x10] sm:$0xff]  ;;  %v528_v10 = vpack.c.bf16 %v44_v7, %v43_v5  ;;  %492 = vmatprep.mubr.msk.f32.mxu0 %vm52_vm0, %v37_v8  ;;  %v150_v11 = vld [vmem:[%s693_s0] sm:$0x3]  ;;  %v38_v15 = vld [vmem:[%s694_s1 + $0x8] sm:$0xff]  ;;  %v152_v28 = vand.u32 127, %v151_v0 }
  0x15   :  { %495 = vmatprep.mubr.msk.f32.mxu1 %vm52_vm0, %v39_v9  ;;  %525 = vmatprep.subr.bf16.mxu0 %v524_v6  ;;  %v40_v16 = vld [vmem:[%s694_s1 + $0x18] sm:$0xff]  ;;  %vm201_vm2 = vcmp.lt.s32.totalorder %v150_v11, 0  ;;  %v447_v24 = vld [vmem:[%s696_s3] ss:$0 sm:$0xff]  ;;  %v427_v3 = vld [vmem:[%s698_s5 + $0x8] sm:$0xff]  ;;  %vm437_vm10 = vcmask 253952  }
  0x16   :  { %v155_v2 = vsub.s32 0, %v154_v1  ;;  %v170_v12 = vsub.s32 1, %v154_v1  ;;  %538 = vmatprep.subr.bf16.mxu1 %v524_v6  ;;  %527 = vmatpush3.bf16.msra.mxu0 %v524_v6  ;;  %v458_v19 = vsel %vm201_vm2, 1.0, %v577_v18  ;;  %v459_v49 = vld [vmem:[%s697_s4] ss:$0 sm:$0xff] }
  0x17   :  { %540 = vmatpush3.bf16.msra.mxu1 %v524_v6  ;;  %529 = vmatprep.subr.bf16.mxu0 %v528_v10  ;;  %v426_v55 = vld [vmem:[%s698_s5] sm:$0xff] }
  0x18   :  { %v156_v13 = vrot.slane %v150_v11, %v155_v2  ;;  %539 = vmatprep.subr.bf16.mxu1 %v528_v10  ;;  %v171_v14 = vrot.slane %v150_v11, %v170_v12  ;;  %v207_v20 = vrot.slane %v458_v19, %v155_v2  ;;  %v222_v21 = vrot.slane %v458_v19, %v170_v12 }
  0x1a   :  { %158 = vbcast.lane.b32.xlu0 %v156_v13, 256  ;;  %162 = vbcast.lane.b32.xlu1 %v156_v13, 264 }
  0x1b   :  { %531 = vmatpush3.bf16.msra.mxu0 %v528_v10  ;;  %541 = vmatpush3.bf16.msra.mxu1 %v528_v10 }
  0x1c   :  { %532 = vmatprep.subr.bf16.mxu1 %v575_v17  ;;  %535 = vmatprep.subr.bf16.mxu0 %v575_v17 }
  0x1e   :  { %173 = vbcast.lane.b32.xlu0 %v171_v14, 256  ;;  %177 = vbcast.lane.b32.xlu1 %v171_v14, 264 }
  0x1f   :  { %493 = vmatmul.mubr.msk.f32.vlgmr.msra.gmra.mrb[0].mxu0 %vm52_vm0, %v38_v15  ;;  %496 = vmatmul.mubr.msk.f32.vlgmr.msra.gmra.mrb[0].mxu1 %vm52_vm0, %v40_v16 }
  0x20   :  { %502 = vmatprep.mubr.msk.f32.mxu1 %vm576_vm1, %v577_v18  ;;  %515 = vmatprep.mubr.msk.f32.mxu0 %vm576_vm1, %v577_v18 }
  0x22   :  { %181 = vbcast.lane.b32.xlu1 %v171_v14, 272  ;;  %166 = vbcast.lane.b32.xlu0 %v156_v13, 272  ;;  %v428_v14 = vld [vmem:[%s698_s5 + $0x10] sm:$0x1] }
  0x26   :  { %213 = vbcast.lane.b32.xlu1 %v207_v20, 264  ;;  %209 = vbcast.lane.b32.xlu0 %v207_v20, 256 }
  0x2a   :  { %224 = vbcast.lane.b32.xlu1 %v222_v21, 256  ;;  %217 = vbcast.lane.b32.xlu0 %v207_v20, 272 }
  0x2e   :  { %228 = vbcast.lane.b32.xlu0 %v222_v21, 264  ;;  %232 = vbcast.lane.b32.xlu1 %v222_v21, 272 }
  0x8c   :  { %v159_v22 = vpop.permute.xlu0 %158  ;;  %v163_v23 = vpop.permute.xlu1 %162 }
  0x8d   :  { %vm183_vm4 = vcmp.eq.s32.totalorder %v159_v22, %v152_v28  ;;  %vm184_vm7 = vcmp.eq.s32.totalorder %v163_v23, %v152_v28 }
  0x8e   :  { %v452_v39 = vsel %vm183_vm4, 1.0, %v577_v18  ;;  %v453_v43 = vsel %vm184_vm7, 1.0, %v577_v18 }
  0x90   :  { %v174_v25 = vpop.permute.xlu0 %173  ;;  %v178_v35 = vpop.permute.xlu1 %177 }
  0x91   :  { %vm186_vm3 = vcmp.eq.s32.totalorder %v174_v25, %v152_v28  ;;  %vm187_vm6 = vcmp.eq.s32.totalorder %v178_v35, %v152_v28 }
  0x92   :  { %v455_v38 = vsel %vm186_vm3, 1.0, %v577_v18  ;;  %v456_v42 = vsel %vm187_vm6, 1.0, %v577_v18 }
  0x94   :  { %v182_v40 = vpop.permute.xlu1 %181  ;;  %v167_v41 = vpop.permute.xlu0 %166 }
  0x95   :  { %vm188_vm8 = vcmp.eq.s32.totalorder %v182_v40, %v152_v28  ;;  %vm185_vm9 = vcmp.eq.s32.totalorder %v167_v41, %v152_v28 }
  0x96   :  { %v457_v44 = vsel %vm188_vm8, 1.0, %v577_v18  ;;  %v454_v45 = vsel %vm185_vm9, 1.0, %v577_v18 }
  0x98   :  { %v210_v46 = vpop.permute.xlu0 %209  ;;  %v214_v47 = vpop.permute.xlu1 %213 }
  0x99   :  { %v241_v51 = vmul.f32 %v459_v49, %v210_v46  ;;  %v242_v63 = vmul.f32 %v459_v49, %v214_v47 }
  0x9c   :  { %v218_v48 = vpop.permute.xlu0 %217  ;;  %v225_v50 = vpop.permute.xlu1 %224 }
  0x9d   :  { %v244_v52 = vmul.f32 %v459_v49, %v225_v50  ;;  %v243_v10 = vmul.f32 %v459_v49, %v218_v48 }
  0xa0   :  { %v229_v53 = vpop.permute.xlu0 %228  ;;  %v233_v62 = vpop.permute.xlu1 %232 }
  0xa1   :  { %v245_v61 = vmul.f32 %v459_v49, %v229_v53  ;;  %v246_v9 = vmul.f32 %v459_v49, %v233_v62 }
  0xf2   :  { %v494_v26 = vpop.f32.mrb[0].mxu0  ;;  %v497_v27 = vpop.f32.mrb[0].mxu1 }
  0xf3   :  { %v137_v29 = vadd.f32 %v494_v26, %v447_v24  ;;  %v147_v30 = vadd.f32 %v497_v27, %v447_v24  ;;  %v131_v31 = vpop.f32.mrb[1].mxu0  ;;  %v141_v32 = vpop.f32.mrb[1].mxu1 }
  0xf4   :  { %v132_v33 = vadd.f32 %v447_v24, %v131_v31  ;;  %v142_v34 = vadd.f32 %v447_v24, %v141_v32 }
  0xf6   :  { %v533_v36 = vpack.c.bf16 %v137_v29, %v132_v33  ;;  %v536_v37 = vpack.c.bf16 %v147_v30, %v142_v34 }
  0xf8   :  { %534 = vmatpush3.bf16.msra.mxu1 %v533_v36  ;;  %537 = vmatpush3.bf16.msra.mxu0 %v536_v37 }
  0xfb   :  { %503 = vmatmul.mubr.msk.f32.vlgmr.msra.gmra.mrb[2].mxu1 %vm247_vm5, %v452_v39  ;;  %516 = vmatmul.mubr.msk.f32.vlgmr.msra.gmra.mrb[2].mxu0 %vm247_vm5, %v455_v38 }
  0xfc   :  { %505 = vmatprep.mubr.msk.f32.mxu1 %vm576_vm1, %v577_v18  ;;  %518 = vmatprep.mubr.msk.f32.mxu0 %vm576_vm1, %v577_v18 }
  0xff   :  { %506 = vmatmul.mubr.msk.f32.gmra.mrb[4].mxu1 %vm247_vm5, %v453_v43  ;;  %519 = vmatmul.mubr.msk.f32.gmra.mrb[4].mxu0 %vm247_vm5, %v456_v42 }
 0x100   :  { %508 = vmatprep.mubr.msk.f32.mxu1 %vm576_vm1, %v577_v18  ;;  %521 = vmatprep.mubr.msk.f32.mxu0 %vm576_vm1, %v577_v18 }
 0x103   :  { %509 = vmatmul.mubr.msk.f32.gmra.mrb[6].mxu1 %vm247_vm5, %v454_v45  ;;  %522 = vmatmul.mubr.msk.f32.gmra.mrb[6].mxu0 %vm247_vm5, %v457_v44 }
 0x1ce   :  { %v323_v54 = vpop.f32.mrb[2].mxu1  ;;  %v412_v56 = vpop.f32.mrb[2].mxu0 }
 0x1cf   :  { %v324_v57 = vadd.f32 %v323_v54, %v241_v51  ;;  %v413_v58 = vadd.f32 %v412_v56, %v244_v52  ;;  %v504_v59 = vpop.f32.mrb[3].mxu1  ;;  %v517_v60 = vpop.f32.mrb[3].mxu0 }
 0x1d1   :  { %v429_v0 = vadd.f32 %v426_v55, %v324_v57  ;;  %v432_v1 = vadd.f32 %v426_v55, %v413_v58 }
 0x1d2   :  { %v328_v2 = vpop.f32.mrb[4].mxu1  ;;  %v417_v4 = vpop.f32.mrb[4].mxu0 }
 0x1d3   :  { %435 = vst.msk [vmem:[%s699_s6] sm:$0xff] %vm52_vm0, %v429_v0  ;;  %439 = vst.msk [vmem:[%s699_s6 + $0x18] sm:$0xff] %vm52_vm0, %v432_v1  ;;  %v329_v5 = vadd.f32 %v328_v2, %v242_v63  ;;  %v418_v6 = vadd.f32 %v417_v4, %v245_v61  ;;  %v507_v7 = vpop.f32.mrb[5].mxu1  ;;  %v520_v8 = vpop.f32.mrb[5].mxu0 }
 0x1d5   :  { %v430_v11 = vadd.f32 %v427_v3, %v329_v5  ;;  %v433_v12 = vadd.f32 %v427_v3, %v418_v6 }
 0x1d6   :  { %v333_v13 = vpop.f32.mrb[6].mxu1  ;;  %v422_v15 = vpop.f32.mrb[6].mxu0 }
 0x1d7   :  { %436 = vst.msk [vmem:[%s699_s6 + $0x8] sm:$0xff] %vm52_vm0, %v430_v11  ;;  %440 = vst.msk [vmem:[%s699_s6 + $0x20] sm:$0xff] %vm52_vm0, %v433_v12  ;;  %v334_v16 = vadd.f32 %v333_v13, %v243_v10  ;;  %v423_v17 = vadd.f32 %v422_v15, %v246_v9  ;;  %v510_v18 = vpop.f32.mrb[7].mxu1  ;;  %v523_v19 = vpop.f32.mrb[7].mxu0 }
 0x1d9   :  { %v431_v20 = vadd.f32 %v428_v14, %v334_v16  ;;  %v434_v21 = vadd.f32 %v428_v14, %v423_v17 }
 0x1db   :  { %438 = vst.msk [vmem:[%s699_s6 + $0x10] sm:$0x1] %vm437_vm10, %v431_v20  ;;  %441 = vst.msk [vmem:[%s699_s6 + $0x28] sm:$0x1] %vm437_vm10, %v434_v21 }
 0x1dc   :  { %446 = vsyncpa [#allocation3], 1 }

</bundles_post_ra>
